<compile_context>
chip_gen: v6e
topology: v6e:2x2x1
jax: 0.10.0
libtpu: 0.0.40
codegen_flags: <defaults>
</compile_context>

<pallas_src>
import functools

import jax
import jax.numpy as jnp
from jax.experimental import pallas as pl
from jax.experimental.pallas import tpu as pltpu

_VMEM_LIMIT = 48 * 1024 * 1024
_NEG_INF = -1e30


def _round_up(n, m):
    return (n + m - 1) // m * m


def _pick_tile(n, max_tile=512, align=128):
    """Pick a row tile and padded extent such that tile divides the extent."""
    n_pad = _round_up(max(n, align), align)
    if n_pad >= max_tile:
        n_pad = _round_up(n_pad, max_tile)
        return max_tile, n_pad
    return n_pad, n_pad


# ---------------------------------------------------------------------------
# Kernel 1: fused projection (NodeMLP [+bias+ReLU on first dn cols] | GAT W |
#           W@attn_l | W@attn_r) -> one lane-dense f32 slab.
# ---------------------------------------------------------------------------
def _project_kernel(x_ref, w_ref, b_ref, m_ref, o_ref):
    y = jnp.dot(x_ref[...], w_ref[...], preferred_element_type=jnp.float32)
    y = y + b_ref[...]
    # ReLU only where the column mask is set (the NodeMLP columns).
    o_ref[...] = jnp.where(m_ref[...] > 0.0, jnp.maximum(y, 0.0), y)


def project(x_bf, w_pad, b_row, relu_mask, *, tm):
    n, fin = x_bf.shape
    wpad = w_pad.shape[1]
    return pl.pallas_call(
        _project_kernel,
        grid=(n // tm,),
        in_specs=[
            pl.BlockSpec((tm, fin), lambda i: (i, 0)),        # activations stream
            pl.BlockSpec(w_pad.shape, lambda i: (0, 0)),      # resident weights
            pl.BlockSpec((1, wpad), lambda i: (0, 0)),        # padded bias row
            pl.BlockSpec((1, wpad), lambda i: (0, 0)),        # relu column mask
        ],
        out_specs=pl.BlockSpec((tm, wpad), lambda i: (i, 0)), # lane-dense slab
        out_shape=jax.ShapeDtypeStruct((n, wpad), jnp.float32),
        compiler_params=pltpu.CompilerParams(
            dimension_semantics=("parallel",),
            vmem_limit_bytes=_VMEM_LIMIT),
    )(x_bf, w_pad, b_row, relu_mask)


# ---------------------------------------------------------------------------
# Kernel 2: GAT edge-softmax + aggregation + mean(heads) + relu.
#   Grid: (dst tiles [parallel], src tiles [arbitrary]); rescale-free online
#   softmax (global per-head shift); denominator folded into the matmul via a
#   ones column appended to wh; per-head f32 accumulator in VMEM scratch.
# ---------------------------------------------------------------------------
def _gat_attention_kernel(bias_ref, elt_ref, er_ref, shift_ref, whx_ref,
                          bmean_ref, o_ref, acc_ref, *, num_heads, fo, inv_heads):
    k = pl.program_id(1)

    @pl.when(k == 0)
    def _():
        acc_ref[...] = jnp.zeros_like(acc_ref)

    bias = bias_ref[...].astype(jnp.float32)          # (TM, TK) 0 / -1e30
    er = er_ref[...]                                  # (TM, H)
    shift = shift_ref[...]                            # (TM, H) leaky(er + max el)
    elt = elt_ref[...]                                # (H, TK)
    for h in range(num_heads):
        e = er[:, h:h + 1] + elt[h:h + 1, :]          # (TM, TK)
        e = jnp.where(e >= 0.0, e, 0.2 * e)           # leaky_relu(0.2)
        # masked entries: bias = -1e30 -> exp underflows to exactly 0
        p = jnp.exp(e + bias - shift[:, h:h + 1])
        acc_ref[h] += jnp.dot(p.astype(jnp.bfloat16), whx_ref[h],
                              preferred_element_type=jnp.float32)

    @pl.when(k == pl.num_programs(1) - 1)
    def _():
        out = jnp.zeros((o_ref.shape[0], fo), jnp.float32)
        for h in range(num_heads):
            agg = acc_ref[h]                          # (TM, F+1): [numerator|denom]
            inv = pl.reciprocal(jnp.maximum(agg[:, fo:fo + 1], 1e-30), approx=True)
            out = out + agg[:, :fo] * inv
        o_ref[...] = jnp.maximum(out * inv_heads + bmean_ref[...], 0.0)


def gat_attention(bias_mask, el_t, er, shift, whx, b_mean, *, num_heads, fo, tm, tk):
    n_dst, n_src = bias_mask.shape
    kern = functools.partial(_gat_attention_kernel, num_heads=num_heads,
                             fo=fo, inv_heads=1.0 / num_heads)
    return pl.pallas_call(
        kern,
        grid=(n_dst // tm, n_src // tk),
        in_specs=[
            pl.BlockSpec((tm, tk), lambda i, k: (i, k)),            # additive mask
            pl.BlockSpec((num_heads, tk), lambda i, k: (0, k)),     # el^T src tile
            pl.BlockSpec((tm, num_heads), lambda i, k: (i, 0)),     # er dst tile
            pl.BlockSpec((tm, num_heads), lambda i, k: (i, 0)),     # softmax shift
            pl.BlockSpec((num_heads, tk, fo + 1), lambda i, k: (0, k, 0)),  # wh|1
            pl.BlockSpec((1, fo), lambda i, k: (0, 0)),             # mean-bias
        ],
        out_specs=pl.BlockSpec((tm, fo), lambda i, k: (i, 0)),
        out_shape=jax.ShapeDtypeStruct((n_dst, fo), jnp.float32),
        scratch_shapes=[pltpu.VMEM((num_heads, tm, fo + 1), jnp.float32)],
        compiler_params=pltpu.CompilerParams(
            dimension_semantics=("parallel", "arbitrary"),
            vmem_limit_bytes=_VMEM_LIMIT),
    )(bias_mask, el_t, er, shift, whx, b_mean)


# ---------------------------------------------------------------------------
# Kernel 3: EdgeMLP (4 Linears, sigmoid x3), tiled over edge rows,
#           lane-dense (padded-to-128) output.
# ---------------------------------------------------------------------------
def _edge_mlp_kernel(feat_ref, w1, b1, w2, b2, w3, b3, w4, b4, o_ref):
    h = feat_ref[...]                                               # bf16
    h = jax.nn.sigmoid(jnp.dot(h, w1[...],
                               preferred_element_type=jnp.float32) + b1[...])
    h = jax.nn.sigmoid(jnp.dot(h.astype(jnp.bfloat16), w2[...],
                               preferred_element_type=jnp.float32) + b2[...])
    h = jax.nn.sigmoid(jnp.dot(h.astype(jnp.bfloat16), w3[...],
                               preferred_element_type=jnp.float32) + b3[...])
    o_ref[...] = jnp.dot(h.astype(jnp.bfloat16), w4[...],
                         preferred_element_type=jnp.float32) + b4[...]


def edge_mlp(feat, w1, b1, w2, b2, w3, b3, w4, b4, *, te):
    e_pad, d_in = feat.shape
    out_pad = w4.shape[1]

    def full(arr):
        return pl.BlockSpec(arr.shape, lambda i: (0, 0))

    return pl.pallas_call(
        _edge_mlp_kernel,
        grid=(e_pad // te,),
        in_specs=[pl.BlockSpec((te, d_in), lambda i: (i, 0)),
                  full(w1), full(b1), full(w2), full(b2),
                  full(w3), full(b3), full(w4), full(b4)],
        out_specs=pl.BlockSpec((te, out_pad), lambda i: (i, 0)),
        out_shape=jax.ShapeDtypeStruct((e_pad, out_pad), jnp.float32),
        compiler_params=pltpu.CompilerParams(
            dimension_semantics=("parallel",),
            vmem_limit_bytes=_VMEM_LIMIT),
    )(feat, w1, b1, w2, b2, w3, b3, w4, b4)


# ------------------------------ full model ------------------------------
def edge_pred_model(params, x, src, dst, num_nodes, attn_heads):
    fin = x.shape[1]
    tm, n_pad = _pick_tile(num_nodes)       # node row tile + padded node count
    tk = tm                                 # src tile (divides n_pad too)

    # ---- parameter prepacking (cheap; cached in a real deployment) ----
    wn, bn = params["node_w"], params["node_b"]
    dn = wn.shape[1]

    def gat_prepack(g, fin_g):
        w, b, al, ar = g["w"], g["b"], g["al"], g["ar"]
        nh, fo = al.shape
        w3 = w.reshape(fin_g, nh, fo)
        lcol = jnp.einsum('ihf,hf->ih', w3, al)       # W_h @ attn_l_h  -> (fin, H)
        rcol = jnp.einsum('ihf,hf->ih', w3, ar)       # W_h @ attn_r_h  -> (fin, H)
        b_mean = b.reshape(nh, fo).sum(axis=0, keepdims=True) / nh    # (1, fo)
        return w, lcol, rcol, b_mean, nh, fo

    g1, g2 = params["gat1"], params["gat2"]
    w1, lc1, rc1, bmean1, nh, f1 = gat_prepack(g1, fin)
    w2, lc2, rc2, bmean2, _, f2 = gat_prepack(g2, f1)
    assert nh == attn_heads

    def pack_proj_weights(blocks, bias_first_cols=None):
        wcat = jnp.concatenate(blocks, axis=1)
        width = _round_up(wcat.shape[1], 128)         # lane-dense output slab width
        wpad = jnp.zeros((wcat.shape[0], width), jnp.float32)
        wpad = wpad.at[:, :wcat.shape[1]].set(wcat)
        brow = jnp.zeros((1, width), jnp.float32)
        rmask = jnp.zeros((1, width), jnp.float32)
        if bias_first_cols is not None:
            bvals, ncols = bias_first_cols
            brow = brow.at[:, :ncols].set(bvals)
            rmask = rmask.at[:, :ncols].set(1.0)
        return wpad.astype(jnp.bfloat16), brow, rmask

    w_cat1, brow1, rmask1 = pack_proj_weights([wn, w1, lc1, rc1], (bn, dn))
    w_cat2, brow2, rmask2 = pack_proj_weights([w2, lc2, rc2])

    # ---- pad node dim, bf16 activations for the MXU ----
    x_pad = jnp.zeros((n_pad, fin), jnp.bfloat16).at[:num_nodes].set(
        x.astype(jnp.bfloat16))

    # Additive attention-bias mask: 0 where edge u->v exists, -1e30 elsewhere.
    # TODO(synk): bit-pack / go CSR for production graph sizes (O(N^2) HBM).
    bias_mask = jnp.full((n_pad, n_pad), _NEG_INF, jnp.bfloat16).at[dst, src].set(0.0)

    def split_slab(slab, c0, heads, fo):
        wh = slab[:, c0:c0 + heads * fo]
        el = slab[:, c0 + heads * fo:c0 + heads * fo + heads]
        er = slab[:, c0 + heads * fo + heads:c0 + heads * fo + 2 * heads]
        return wh, el, er

    def pack_attention_side_inputs(wh, el, er, heads, fo):
        n = wh.shape[0]
        # TODO(synk): emit wh directly in (H, N, F+1) bf16 layout from the
        # projection kernel to skip this XLA reshape/transpose round trip.
        whx = wh.reshape(n, heads, fo).transpose(1, 0, 2)            # (H, N, F)
        whx = jnp.concatenate([whx, jnp.ones((heads, n, 1), jnp.float32)],
                              axis=-1).astype(jnp.bfloat16)          # (H, N, F+1)
        el_t = jnp.transpose(el)                                     # (H, N)
        max_el = jnp.max(el[:num_nodes], axis=0, keepdims=True)      # (1, H)
        shift = er + max_el                                          # upper bound
        shift = jnp.where(shift >= 0.0, shift, 0.2 * shift)          # leaky_relu
        return whx, el_t, shift

    # ---- layer 1: fused NodeMLP + GAT1 projection (one wide bf16 matmul) ----
    slab1 = project(x_pad, w_cat1, brow1, rmask1, tm=tm)
    h1 = slab1[:, :dn]
    wh1, el1, er1 = split_slab(slab1, dn, attn_heads, f1)
    whx1, elt1, shift1 = pack_attention_side_inputs(wh1, el1, er1, attn_heads, f1)
    h_g1 = gat_attention(bias_mask, elt1, er1, shift1, whx1, bmean1,
                         num_heads=attn_heads, fo=f1, tm=tm, tk=tk)

    # ---- layer 2 ----
    slab2 = project(h_g1.astype(jnp.bfloat16), w_cat2, brow2, rmask2, tm=tm)
    wh2, el2, er2 = split_slab(slab2, 0, attn_heads, f2)
    whx2, elt2, shift2 = pack_attention_side_inputs(wh2, el2, er2, attn_heads, f2)
    h_g2 = gat_attention(bias_mask, elt2, er2, shift2, whx2, bmean2,
                         num_heads=attn_heads, fo=f2, tm=tm, tk=tk)

    # ---- EdgeMLP on gathered per-edge features ----
    (w1e, b1e), (w2e, b2e), (w3e, b3e), (w4e, b4e) = params["edge_mlp"]
    # In the reference, h2_v := edges.src['h2'] == h2_u, so fold lin1's two h2
    # row-blocks together and gather h_g2[src] only once (25% less gather/K).
    w1f = jnp.concatenate([w1e[:dn], w1e[dn:2 * dn],
                           w1e[2 * dn:2 * dn + f2] + w1e[2 * dn + f2:]], axis=0)

    # TODO(synk): fuse these row gathers into the EdgeMLP kernel via scalar-
    # prefetched src/dst + DMA gather to avoid the XLA-side feat materialization.
    feat = jnp.concatenate([h1[src], h1[dst], h_g2[src]], axis=1)
    e_cnt = src.shape[0]
    te, e_pad = _pick_tile(e_cnt)
    feat_pad = jnp.zeros((e_pad, feat.shape[1]), jnp.bfloat16).at[:e_cnt].set(
        feat.astype(jnp.bfloat16))

    out_features = w4e.shape[1]
    out_pad = _round_up(out_features, 128)            # lane-dense output slab
    w4p = jnp.zeros((w4e.shape[0], out_pad), jnp.float32).at[:, :out_features].set(w4e)
    b4p = jnp.zeros((1, out_pad), jnp.float32).at[:, :out_features].set(b4e)

    score_pad = edge_mlp(
        feat_pad,
        w1f.astype(jnp.bfloat16), b1e,
        w2e.astype(jnp.bfloat16), b2e,
        w3e.astype(jnp.bfloat16), b3e,
        w4p.astype(jnp.bfloat16), b4p,
        te=te)
    return score_pad[:e_cnt, :out_features]


# ------------------------------ param init ------------------------------
def init_params(key, nodemlp_size, gnn_size, edgemlp_size, out_features, attn_heads):
    def lin(k, fan_in, fan_out):
        kw, kb = jax.random.split(k)
        w = jax.random.normal(kw, (fan_in, fan_out), jnp.float32) * 0.1
        b = jax.random.normal(kb, (1, fan_out), jnp.float32) * 0.1
        return w, b

    keys = jax.random.split(key, 10)
    params = {}
    params["node_w"], params["node_b"] = lin(keys[0], nodemlp_size[0], nodemlp_size[1])

    def gat(k, fin, fout):
        k1, k2, k3, k4 = jax.random.split(k, 4)
        return {
            "w": jax.random.normal(k1, (fin, attn_heads * fout), jnp.float32) * 0.1,
            "b": jax.random.normal(k2, (1, attn_heads * fout), jnp.float32) * 0.1,
            "al": jax.random.normal(k3, (attn_heads, fout), jnp.float32) * 0.1,
            "ar": jax.random.normal(k4, (attn_heads, fout), jnp.float32) * 0.1,
        }

    params["gat1"] = gat(keys[1], gnn_size[0], gnn_size[1])
    params["gat2"] = gat(keys[2], gnn_size[1], gnn_size[2])

    dims = list(edgemlp_size) + [out_features]
    params["edge_mlp"] = tuple(
        lin(keys[3 + i], dims[i], dims[i + 1]) for i in range(4)
    )
    return params


if __name__ == "__main__":
    # Small synthetic sizes consistent with the module:
    #   nodemlp_size=[16,32], gnn_size=[16,32,32], attn_heads=2
    #   edgemlp_size[0] = 2*32 + 2*32 = 128 -> [128,64,64,32], out_features=1
    N_NODES, IN_FEATS, ATTN_HEADS = 8, 16, 2
    nodemlp_size = [IN_FEATS, 32]
    gnn_size = [IN_FEATS, 32, 32]
    edgemlp_size = [128, 64, 64, 32]
    out_features = 1

    key = jax.random.PRNGKey(0)
    k_param, k_x = jax.random.split(key)
    params = init_params(k_param, nodemlp_size, gnn_size, edgemlp_size,
                         out_features, ATTN_HEADS)

    x = jax.random.normal(k_x, (N_NODES, IN_FEATS), jnp.float32)

    # Deterministic graph: ring edges + shift-by-3 edges (every node has in-degree >= 1).
    src = jnp.array(list(range(N_NODES)) * 2, jnp.int32)
    dst = jnp.array([(i + 1) % N_NODES for i in range(N_NODES)]
                    + [(i + 3) % N_NODES for i in range(N_NODES)], jnp.int32)

    pred = edge_pred_model(params, x, src, dst, N_NODES, ATTN_HEADS)
    pred = jax.block_until_ready(pred)
    assert pred.shape == (src.shape[0], out_features) and pred.dtype == jnp.float32
    print("KERNEL_OK")
</pallas_src>

<mosaic_0001>
module attributes {stable_mosaic.version = 11 : i64} {
  func.func @_project_kernel(%arg0: i32, %arg1: memref<128x16xbf16, #tpu.memory_space<vmem>>, %arg2: memref<16x128xbf16, #tpu.memory_space<vmem>>, %arg3: memref<1x128xf32, #tpu.memory_space<vmem>>, %arg4: memref<1x128xf32, #tpu.memory_space<vmem>>, %arg5: memref<128x128xf32, #tpu.memory_space<vmem>>) attributes {dimension_semantics = [#tpu.dimension_semantics<parallel>], iteration_bounds = array<i64: 1>, scalar_prefetch = 0 : i64, scratch_operands = 0 : i64, tpu.core_type = #tpu.core_type<tc>, window_params = [{transform_indices = @transform_0, window_bounds = array<i64: 128, 16>}, {pipeline_mode = #tpu.pipeline_mode<synchronous>, transform_indices = @transform_1, window_bounds = array<i64: 16, 128>}, {pipeline_mode = #tpu.pipeline_mode<synchronous>, transform_indices = @transform_2, window_bounds = array<i64: 1, 128>}, {pipeline_mode = #tpu.pipeline_mode<synchronous>, transform_indices = @transform_3, window_bounds = array<i64: 1, 128>}, {transform_indices = @transform_4, window_bounds = array<i64: 128, 128>}]} {
    %c0 = arith.constant 0 : index
    %c0_0 = arith.constant 0 : index
    %0 = vector.load %arg1[%c0, %c0_0] : memref<128x16xbf16, #tpu.memory_space<vmem>>, vector<128x16xbf16>
    %c0_1 = arith.constant 0 : index
    %c0_2 = arith.constant 0 : index
    %1 = vector.load %arg2[%c0_1, %c0_2] : memref<16x128xbf16, #tpu.memory_space<vmem>>, vector<16x128xbf16>
    %cst = arith.constant dense<0.000000e+00> : vector<128x128xf32>
    %2 = tpu.matmul %0, %1, %cst {dimension_numbers = #tpu.dot_dimension_numbers<[1], [0], [0], [1], [0, 0, 1, 1], [], []>} : vector<128x16xbf16>, vector<16x128xbf16>, vector<128x128xf32> -> vector<128x128xf32>
    %c0_3 = arith.constant 0 : index
    %c0_4 = arith.constant 0 : index
    %3 = vector.load %arg3[%c0_3, %c0_4] : memref<1x128xf32, #tpu.memory_space<vmem>>, vector<1x128xf32>
    %4 = vector.broadcast %3 : vector<1x128xf32> to vector<128x128xf32>
    %5 = arith.addf %2, %4 : vector<128x128xf32>
    %c0_5 = arith.constant 0 : index
    %c0_6 = arith.constant 0 : index
    %6 = vector.load %arg4[%c0_5, %c0_6] : memref<1x128xf32, #tpu.memory_space<vmem>>, vector<1x128xf32>
    %cst_7 = arith.constant 0.000000e+00 : f32
    %7 = vector.broadcast %cst_7 : f32 to vector<1x128xf32>
    %8 = arith.cmpf ogt, %6, %7 : vector<1x128xf32>
    %cst_8 = arith.constant 0.000000e+00 : f32
    %9 = vector.broadcast %cst_8 : f32 to vector<128x128xf32>
    %10 = arith.maximumf %5, %9 : vector<128x128xf32>
    %11 = vector.shape_cast %8 : vector<1x128xi1> to vector<1x128xi1>
    %12 = vector.broadcast %11 : vector<1x128xi1> to vector<128x128xi1>
    %13 = arith.select %12, %10, %5 : vector<128x128xi1>, vector<128x128xf32>
    %c0_9 = arith.constant 0 : index
    %c0_10 = arith.constant 0 : index
    %14 = vector.load %arg5[%c0_9, %c0_10] : memref<128x128xf32, #tpu.memory_space<vmem>>, vector<128x128xf32>
    tpu.vector_store %arg5[%c0_9, %c0_10], %13 {strides = array<i32>} : memref<128x128xf32, #tpu.memory_space<vmem>>, vector<128x128xf32>,
    return
  }
  func.func @transform_0(%arg0: i32) -> (i32, i32) {
    %c0_i32 = arith.constant 0 : i32
    %c0_i32_0 = arith.constant 0 : i32
    return %arg0, %c0_i32 : i32, i32
  }
  func.func @transform_1(%arg0: i32) -> (i32, i32) {
    %c0_i32 = arith.constant 0 : i32
    %c0_i32_0 = arith.constant 0 : i32
    %c0_i32_1 = arith.constant 0 : i32
    return %c0_i32, %c0_i32_0 : i32, i32
  }
  func.func @transform_2(%arg0: i32) -> (i32, i32) {
    %c0_i32 = arith.constant 0 : i32
    %c0_i32_0 = arith.constant 0 : i32
    %c0_i32_1 = arith.constant 0 : i32
    return %c0_i32, %c0_i32_0 : i32, i32
  }
  func.func @transform_3(%arg0: i32) -> (i32, i32) {
    %c0_i32 = arith.constant 0 : i32
    %c0_i32_0 = arith.constant 0 : i32
    %c0_i32_1 = arith.constant 0 : i32
    return %c0_i32, %c0_i32_0 : i32, i32
  }
  func.func @transform_4(%arg0: i32) -> (i32, i32) {
    %c0_i32 = arith.constant 0 : i32
    %c0_i32_0 = arith.constant 0 : i32
    return %arg0, %c0_i32 : i32, i32
  }
}

</mosaic_0001>

<bundles_post_ra>
// kernel: tpu_custom_call.1
= control target key start
LH: loop header
LB: loop body
LE: loop exit
PB: predicated region body
PF: predicated region fallthrough
CT: control target
= control target key end

     0   :  { %vm90_vm0 = vcmask 130048   ;;  %s492_s0 = inlined_call_operand.vmem [shape: bf16[128,16], index: 0, kind: input, shape index: {}]   ;;  %s493_s1 = inlined_call_operand.vmem [shape: bf16[16,128], index: 1, kind: input, shape index: {}]   ;;  %s494_s2 = inlined_call_operand.vmem [shape: f32[1,128], index: 2, kind: input, shape index: {}]   ;;  %s495_s3 = inlined_call_operand.vmem [shape: f32[1,128], index: 3, kind: input, shape index: {}]   ;;  %s496_s4 = inlined_call_operand.hbm [shape: f32[128,128], index: 4, kind: output, shape index: {}]  }
   0x1   :  { %v335_v0 = vld [vmem:[%s493_s1] sm:$0xff]   ;;  %v338_v3 = vld [vmem:[%s492_s0 + $0x8] sm:$0xff]   ;;  %v340_v5 = vld [vmem:[%s492_s0 + $0x10] sm:$0xff]  }
   0x2   :  { %v336_v1 = vld [vmem:[%s492_s0] sm:$0xff]   ;;  %311 = vmatprep.subr.bf16.mxu0 %v335_v0  ;;  %329 = vmatprep.subr.bf16.mxu1 %v335_v0  ;;  %v339_v4 = vld [vmem:[%s492_s0 + $0x28] sm:$0xff]   ;;  %v341_v6 = vld [vmem:[%s492_s0 + $0x30] sm:$0xff]  }
   0x3   :  { %v337_v2 = vld [vmem:[%s492_s0 + $0x20] sm:$0xff]   ;;  %312 = vmatpush3.bf16.msra.mxu0 %v335_v0  ;;  %330 = vmatpush3.bf16.msra.mxu1 %v335_v0 }
   0x4   :  { %313 = vmatprep.mubr.msk.bf16.mxu0 %vm90_vm0, %v336_v1  ;;  %321 = vmatprep.mubr.msk.bf16.mxu1 %vm90_vm0, %v337_v2 }
   0x6   :  { %314 = vmatmul.mubr.msk.bf16.vlgmr.msra.gmra.mxu0 %vm90_vm0, %v338_v3  ;;  %322 = vmatmul.mubr.msk.bf16.vlgmr.msra.gmra.mxu1 %vm90_vm0, %v339_v4 }
   0x7   :  { %317 = vmatprep.mubr.msk.bf16.mxu0 %vm90_vm0, %v340_v5  ;;  %325 = vmatprep.mubr.msk.bf16.mxu1 %vm90_vm0, %v341_v6 }
   0x8   :  { %9 = vsyncpa [#allocation3], 0  ;;  %v342_v7 = vld [vmem:[%s492_s0 + $0x18] sm:$0xff]   ;;  %v231_v9 = vlaneseq  ;;  %v212_v10 = vld [vmem:[%s495_s3] sm:$0x1]  ;;  %v366_v13 = vmov 0  }
   0x9   :  { %v343_v8 = vld [vmem:[%s492_s0 + $0x38] sm:$0xff]   ;;  %vm213_vm1 = vcmp.gt.f32.partialorder %v212_v10, 0.0  ;;  %v436_v15 = vld [vmem:[%s494_s2] ss:$0 sm:$0xff]  ;;  %s367_s0 = smov [#allocation2]  }
   0xa   :  { %v232_v11 = vshrl.u32 %v231_v9, 7  ;;  %v230_v14 = vsel %vm213_vm1, 1, %v366_v13  ;;  %s273_s2 = sshll.u32 %s367_s0, 4  ;;  %s274_s2 = int_to_ptr.vmem [resolvable:$true] %s273_s2 }
   0xb   :  { %s344_s3 = scalar_lea.vmem %s274_s2, 2048  ;;  %p349_p1 = scmp.lt.s32.totalorder %s274_s2, %s274_s2 }
   0xc   :  { %v233_v12 = vsub.s32 0, %v232_v11  ;;  %p345_p0 = scmp.ne.s32.totalorder %s274_s2, %s344_s3  ;;  %p350_p2 = scmp.lt.s32.totalorder %s344_s3, %s344_s3 }
   0xe   :  { %318 = vmatmul.mubr.msk.bf16.gmra.mxu0 %vm90_vm0, %v342_v7  ;;  %326 = vmatmul.mubr.msk.bf16.gmra.mxu1 %vm90_vm0, %v343_v8  ;;  %v438_v16 = vrot.slane %v230_v14, %v233_v12  ;;  %p351_p3 = por %p350_p2, %p349_p1 }
  0x10   :  { %vm235_vm2 = vcmp.eq.s32.totalorder %v438_v16, 1  ;;  %p352_p4 = pnand %p351_p3, %p345_p0 }
  0xc6   :  { %v315_v17 = vpop.f32.mrf.mxu0  ;;  %v323_v18 = vpop.f32.mrf.mxu1 }
  0xc7   :  { %v158_v19 = vadd.f32 %v315_v17, %v436_v15  ;;  %v190_v20 = vadd.f32 %v323_v18, %v436_v15 }
  0xc8   :  { %v149_v21 = vpop.f32.mrf.mxu0  ;;  %v181_v22 = vpop.f32.mrf.mxu1 }
  0xc9   :  { %v216_v23 = vmax.f32 %v158_v19, 0.0  ;;  %v224_v24 = vmax.f32 %v190_v20, 0.0  ;;  %v150_v25 = vadd.f32 %v436_v15, %v149_v21  ;;  %v182_v26 = vadd.f32 %v436_v15, %v181_v22 }
  0xca   :  { %v316_v27 = vpop.f32.mrf.mxu0  ;;  %v324_v28 = vpop.f32.mrf.mxu1 }
  0xcb   :  { %v238_v29 = vsel %vm235_vm2, %v216_v23, %v158_v19  ;;  %v246_v30 = vsel %vm235_vm2, %v224_v24, %v190_v20  ;;  %v214_v31 = vmax.f32 %v150_v25, 0.0  ;;  %v222_v32 = vmax.f32 %v182_v26, 0.0 }
  0xcc   :  { %254 = vst [vmem:[#allocation2 + $0x10] sm:$0xff] %v238_v29  ;;  %262 = vst [vmem:[#allocation2 + $0x50] sm:$0xff] %v246_v30  ;;  %v161_v33 = vadd.f32 %v316_v27, %v436_v15  ;;  %v193_v34 = vadd.f32 %v324_v28, %v436_v15  ;;  %v152_v35 = vpop.f32.mrf.mxu0  ;;  %v184_v36 = vpop.f32.mrf.mxu1 }
  0xcd   :  { %v236_v37 = vsel %vm235_vm2, %v214_v31, %v150_v25  ;;  %v244_v38 = vsel %vm235_vm2, %v222_v32, %v182_v26  ;;  %v153_v39 = vadd.f32 %v436_v15, %v152_v35  ;;  %v185_v40 = vadd.f32 %v436_v15, %v184_v36 }
  0xce   :  { %252 = vst [vmem:[#allocation2] sm:$0xff] %v236_v37  ;;  %260 = vst [vmem:[#allocation2 + $0x40] sm:$0xff] %v244_v38  ;;  %v217_v41 = vmax.f32 %v161_v33, 0.0  ;;  %v225_v42 = vmax.f32 %v193_v34, 0.0  ;;  %v319_v43 = vpop.f32.mrf.mxu0  ;;  %v327_v44 = vpop.f32.mrf.mxu1 }
  0xcf   :  { %v215_v45 = vmax.f32 %v153_v39, 0.0  ;;  %v223_v46 = vmax.f32 %v185_v40, 0.0  ;;  %v174_v47 = vadd.f32 %v319_v43, %v436_v15  ;;  %v206_v48 = vadd.f32 %v327_v44, %v436_v15 }
  0xd0   :  { %v239_v49 = vsel %vm235_vm2, %v217_v41, %v161_v33  ;;  %v247_v50 = vsel %vm235_vm2, %v225_v42, %v193_v34  ;;  %v165_v51 = vpop.f32.mrf.mxu0  ;;  %v197_v52 = vpop.f32.mrf.mxu1 }
  0xd1   :  { %255 = vst [vmem:[#allocation2 + $0x18] sm:$0xff] %v239_v49  ;;  %263 = vst [vmem:[#allocation2 + $0x58] sm:$0xff] %v247_v50  ;;  %v237_v53 = vsel %vm235_vm2, %v215_v45, %v153_v39  ;;  %v245_v54 = vsel %vm235_vm2, %v223_v46, %v185_v40  ;;  %v220_v55 = vmax.f32 %v174_v47, 0.0  ;;  %v228_v56 = vmax.f32 %v206_v48, 0.0 }
  0xd2   :  { %253 = vst [vmem:[#allocation2 + $0x8] sm:$0xff] %v237_v53  ;;  %261 = vst [vmem:[#allocation2 + $0x48] sm:$0xff] %v245_v54  ;;  %v166_v57 = vadd.f32 %v436_v15, %v165_v51  ;;  %v198_v58 = vadd.f32 %v436_v15, %v197_v52  ;;  %v320_v59 = vpop.f32.mrf.mxu0  ;;  %v328_v60 = vpop.f32.mrf.mxu1 }
  0xd3   :  { %v242_v61 = vsel %vm235_vm2, %v220_v55, %v174_v47  ;;  %v250_v62 = vsel %vm235_vm2, %v228_v56, %v206_v48  ;;  %v177_v63 = vadd.f32 %v320_v59, %v436_v15  ;;  %v209_v0 = vadd.f32 %v328_v60, %v436_v15 }
  0xd4   :  { %258 = vst [vmem:[#allocation2 + $0x30] sm:$0xff] %v242_v61  ;;  %266 = vst [vmem:[#allocation2 + $0x70] sm:$0xff] %v250_v62  ;;  %v218_v1 = vmax.f32 %v166_v57, 0.0  ;;  %v226_v2 = vmax.f32 %v198_v58, 0.0  ;;  %v168_v3 = vpop.f32.mrf.mxu0  ;;  %v200_v4 = vpop.f32.mrf.mxu1 }
  0xd5   :  { %v221_v5 = vmax.f32 %v177_v63, 0.0  ;;  %v229_v6 = vmax.f32 %v209_v0, 0.0  ;;  %v169_v7 = vadd.f32 %v436_v15, %v168_v3  ;;  %v201_v8 = vadd.f32 %v436_v15, %v200_v4 }
  0xd6   :  { %v240_v9 = vsel %vm235_vm2, %v218_v1, %v166_v57  ;;  %v248_v10 = vsel %vm235_vm2, %v226_v2, %v198_v58 }
  0xd7   :  { %256 = vst [vmem:[#allocation2 + $0x20] sm:$0xff] %v240_v9  ;;  %264 = vst [vmem:[#allocation2 + $0x60] sm:$0xff] %v248_v10  ;;  %v243_v11 = vsel %vm235_vm2, %v221_v5, %v177_v63  ;;  %v251_v12 = vsel %vm235_vm2, %v229_v6, %v209_v0  ;;  %v219_v13 = vmax.f32 %v169_v7, 0.0  ;;  %v227_v14 = vmax.f32 %v201_v8, 0.0 }
  0xd8   :  { %259 = vst [vmem:[#allocation2 + $0x38] sm:$0xff] %v243_v11  ;;  %267 = vst [vmem:[#allocation2 + $0x78] sm:$0xff] %v251_v12 }
  0xd9   :  { %v241_v15 = vsel %vm235_vm2, %v219_v13, %v169_v7  ;;  %v249_v17 = vsel %vm235_vm2, %v227_v14, %v201_v8 }
  0xda   :  { %257 = vst [vmem:[#allocation2 + $0x28] sm:$0xff] %v241_v15  ;;  %265 = vst [vmem:[#allocation2 + $0x68] sm:$0xff] %v249_v17 }
  0xdb   :  { %355 = shalt.err (!%p352_p4)
}
  0xdc   :  { %s368_s10 = smov 128   ;;  %s369_s11 = smov 8  }
  0xdd   :  { %279 = dma.vmem_to_hbm [thread:$0]  %s274_s2, 2048, %s496_s4, [#allocation3], %s368_s10, %s368_s10, %s369_s11  }
  0xde   :  { %364 = dma.done.wait [#allocation3], 2048  }
  0xdf   :  { %365 = vsyncadd [#allocation3], 4294965248 }
  0xe0   :  { %283 = vsyncpa [#allocation3], 1 }

</bundles_post_ra>
